<compile_context>
chip_gen: v7x
topology: tpu7x:2x2x1
jax: 0.10.0
libtpu: 0.0.40
codegen_flags: <defaults>
</compile_context>

<pallas_src>
import jax
import jax.numpy as jnp
from jax.experimental import pallas as pl
from jax.experimental.pallas import tpu as pltpu

# Logical layer widths and their lane-padded (multiple-of-128) counterparts.
_LOGICAL_DIMS = (17, 85, 425, 85, 17, 1)
_PADDED_DIMS = (128, 128, 512, 128, 128, 128)


def _round_up(n, m):
    return (n + m - 1) // m * m


def mlp_kernel(x_ref,
               w1_ref, b1_ref,
               w2_ref, b2_ref,
               w3_ref, b3_ref,
               w4_ref, b4_ref,
               w5_ref, b5_ref,
               o_ref):
    h = x_ref[...]

    h = jnp.dot(h, w1_ref[...], preferred_element_type=jnp.float32) + b1_ref[...]
    h = jnp.maximum(h, 0.0)                                   # act_1 ReLU

    h = jnp.dot(h, w2_ref[...], preferred_element_type=jnp.float32) + b2_ref[...]
    h = jnp.maximum(h, 0.0)                                   # act_2 ReLU

    h = jnp.dot(h, w3_ref[...], preferred_element_type=jnp.float32) + b3_ref[...]
    h = jnp.maximum(h, 0.0)                                   # act_3 ReLU

    h = jnp.dot(h, w4_ref[...], preferred_element_type=jnp.float32) + b4_ref[...]
    h = jnp.maximum(h, 0.0)                                   # act_4 ReLU

    z = jnp.dot(h, w5_ref[...], preferred_element_type=jnp.float32) + b5_ref[...]
    o_ref[...] = jax.nn.sigmoid(z).astype(o_ref.dtype)        # Sigmoid (exp + recip on EUP)


def _pad_params(params):
    """Zero-pad [in,out] weights and [1,out] biases to lane-aligned widths."""
    padded = []
    for li, (w, b) in enumerate(params):
        pin, pout = _PADDED_DIMS[li], _PADDED_DIMS[li + 1]
        wp = jnp.zeros((pin, pout), jnp.float32).at[: w.shape[0], : w.shape[1]].set(w)
        bp = jnp.zeros((1, pout), jnp.float32).at[:, : b.shape[1]].set(b)
        padded.append((wp, bp))
    return padded


def attention_net_forward(x, params, *, tm=512):
    """x: [B, 17] float32 -> [B, 1] float32."""
    B, Din = x.shape
    assert Din == _LOGICAL_DIMS[0]

    # Effective batch tile: large (default 512) for real batches; shrinks to
    # the 8-aligned padded batch for small inputs.  Batch is zero-padded to a
    # multiple of the tile so any B works.
    b_tile = min(tm, _round_up(B, 8))
    b_pad = _round_up(B, b_tile)

    d_in = _PADDED_DIMS[0]
    d_out = _PADDED_DIMS[-1]

    x_p = jnp.zeros((b_pad, d_in), jnp.float32).at[:B, :Din].set(x)

    (w1, b1), (w2, b2), (w3, b3), (w4, b4), (w5, b5) = _pad_params(params)

    def rep_spec(shape):
        # Full-array block, same block for every grid step (weights resident).
        return pl.BlockSpec(shape, lambda i: (0, 0))

    in_specs = [
        pl.BlockSpec((b_tile, d_in), lambda i: (i, 0)),   # x batch tile (lane-dense)
        rep_spec(w1.shape), rep_spec(b1.shape),
        rep_spec(w2.shape), rep_spec(b2.shape),
        rep_spec(w3.shape), rep_spec(b3.shape),
        rep_spec(w4.shape), rep_spec(b4.shape),
        rep_spec(w5.shape), rep_spec(b5.shape),
    ]
    # Lane-dense 128-wide output tile; only column 0 is the logical output.
    out_spec = pl.BlockSpec((b_tile, d_out), lambda i: (i, 0))

    out_padded = pl.pallas_call(
        mlp_kernel,
        out_shape=jax.ShapeDtypeStruct((b_pad, d_out), jnp.float32),
        grid=(b_pad // b_tile,),
        in_specs=in_specs,
        out_specs=out_spec,
        compiler_params=pltpu.CompilerParams(
            dimension_semantics=("parallel",),
            vmem_limit_bytes=48 * 1024 * 1024,  # comfortable on v7x's 64 MiB VMEM
        ),
    )(x_p, w1, b1, w2, b2, w3, b3, w4, b4, w5, b5)

    return out_padded[:B, :1]


def init_params(key):
    """Deterministic init mimicking nn.Linear (uniform +-1/sqrt(fan_in)).

    Weights are stored as [in, out] (transposed vs. PyTorch's [out, in]);
    biases as [1, out].
    """
    dims = [(17, 85), (85, 425), (425, 85), (85, 17), (17, 1)]
    params = []
    for (fan_in, fan_out) in dims:
        key, kw, kb = jax.random.split(key, 3)
        bound = 1.0 / jnp.sqrt(jnp.float32(fan_in))
        w = jax.random.uniform(kw, (fan_in, fan_out), jnp.float32, -bound, bound)
        b = jax.random.uniform(kb, (1, fan_out), jnp.float32, -bound, bound)
        params.append((w, b))
    return params


def reference_forward(x, params):
    h = x
    for i, (w, b) in enumerate(params):
        h = h @ w + b
        if i < len(params) - 1:
            h = jnp.maximum(h, 0.0)
    return jax.nn.sigmoid(h)


if __name__ == "__main__":
    key = jax.random.PRNGKey(0)
    kp, kx = jax.random.split(key)

    params = init_params(kp)
    B = 37  # deliberately not a multiple of the tile: exercises batch padding
    x = jax.random.normal(kx, (B, 17), jnp.float32)

    out = attention_net_forward(x, params)
    out = jax.block_until_ready(out)

    ref = reference_forward(x, params)
    assert out.shape == (B, 1)
    assert jnp.allclose(out, ref, atol=1e-5, rtol=1e-5), "mismatch vs reference"

    print("KERNEL_OK")
</pallas_src>

<mosaic_0001>
module attributes {stable_mosaic.version = 11 : i64} {
  func.func @mlp_kernel(%arg0: i32, %arg1: memref<40x128xf32, #tpu.memory_space<vmem>>, %arg2: memref<128x128xf32, #tpu.memory_space<vmem>>, %arg3: memref<1x128xf32, #tpu.memory_space<vmem>>, %arg4: memref<128x512xf32, #tpu.memory_space<vmem>>, %arg5: memref<1x512xf32, #tpu.memory_space<vmem>>, %arg6: memref<512x128xf32, #tpu.memory_space<vmem>>, %arg7: memref<1x128xf32, #tpu.memory_space<vmem>>, %arg8: memref<128x128xf32, #tpu.memory_space<vmem>>, %arg9: memref<1x128xf32, #tpu.memory_space<vmem>>, %arg10: memref<128x128xf32, #tpu.memory_space<vmem>>, %arg11: memref<1x128xf32, #tpu.memory_space<vmem>>, %arg12: memref<40x128xf32, #tpu.memory_space<vmem>>) attributes {dimension_semantics = [#tpu.dimension_semantics<parallel>], iteration_bounds = array<i64: 1>, scalar_prefetch = 0 : i64, scratch_operands = 0 : i64, tpu.core_type = #tpu.core_type<tc>, window_params = [{transform_indices = @transform_0, window_bounds = array<i64: 40, 128>}, {pipeline_mode = #tpu.pipeline_mode<synchronous>, transform_indices = @transform_1, window_bounds = array<i64: 128, 128>}, {pipeline_mode = #tpu.pipeline_mode<synchronous>, transform_indices = @transform_2, window_bounds = array<i64: 1, 128>}, {pipeline_mode = #tpu.pipeline_mode<synchronous>, transform_indices = @transform_3, window_bounds = array<i64: 128, 512>}, {pipeline_mode = #tpu.pipeline_mode<synchronous>, transform_indices = @transform_4, window_bounds = array<i64: 1, 512>}, {pipeline_mode = #tpu.pipeline_mode<synchronous>, transform_indices = @transform_5, window_bounds = array<i64: 512, 128>}, {pipeline_mode = #tpu.pipeline_mode<synchronous>, transform_indices = @transform_6, window_bounds = array<i64: 1, 128>}, {pipeline_mode = #tpu.pipeline_mode<synchronous>, transform_indices = @transform_7, window_bounds = array<i64: 128, 128>}, {pipeline_mode = #tpu.pipeline_mode<synchronous>, transform_indices = @transform_8, window_bounds = array<i64: 1, 128>}, {pipeline_mode = #tpu.pipeline_mode<synchronous>, transform_indices = @transform_9, window_bounds = array<i64: 128, 128>}, {pipeline_mode = #tpu.pipeline_mode<synchronous>, transform_indices = @transform_10, window_bounds = array<i64: 1, 128>}, {transform_indices = @transform_11, window_bounds = array<i64: 40, 128>}]} {
    %c0 = arith.constant 0 : index
    %c0_0 = arith.constant 0 : index
    %0 = vector.load %arg1[%c0, %c0_0] : memref<40x128xf32, #tpu.memory_space<vmem>>, vector<40x128xf32>
    %c0_1 = arith.constant 0 : index
    %c0_2 = arith.constant 0 : index
    %1 = vector.load %arg2[%c0_1, %c0_2] : memref<128x128xf32, #tpu.memory_space<vmem>>, vector<128x128xf32>
    %cst = arith.constant dense<0.000000e+00> : vector<40x128xf32>
    %2 = tpu.matmul %0, %1, %cst {dimension_numbers = #tpu.dot_dimension_numbers<[1], [0], [0], [1], [0, 0, 1, 1], [], []>} : vector<40x128xf32>, vector<128x128xf32>, vector<40x128xf32> -> vector<40x128xf32>
    %c0_3 = arith.constant 0 : index
    %c0_4 = arith.constant 0 : index
    %3 = vector.load %arg3[%c0_3, %c0_4] : memref<1x128xf32, #tpu.memory_space<vmem>>, vector<1x128xf32>
    %4 = vector.broadcast %3 : vector<1x128xf32> to vector<40x128xf32>
    %5 = arith.addf %2, %4 : vector<40x128xf32>
    %cst_5 = arith.constant 0.000000e+00 : f32
    %6 = vector.broadcast %cst_5 : f32 to vector<40x128xf32>
    %7 = arith.maximumf %5, %6 : vector<40x128xf32>
    %c0_6 = arith.constant 0 : index
    %c0_7 = arith.constant 0 : index
    %8 = vector.load %arg4[%c0_6, %c0_7] : memref<128x512xf32, #tpu.memory_space<vmem>>, vector<128x512xf32>
    %cst_8 = arith.constant dense<0.000000e+00> : vector<40x512xf32>
    %9 = tpu.matmul %7, %8, %cst_8 {dimension_numbers = #tpu.dot_dimension_numbers<[1], [0], [0], [1], [0, 0, 1, 1], [], []>} : vector<40x128xf32>, vector<128x512xf32>, vector<40x512xf32> -> vector<40x512xf32>
    %c0_9 = arith.constant 0 : index
    %c0_10 = arith.constant 0 : index
    %10 = vector.load %arg5[%c0_9, %c0_10] : memref<1x512xf32, #tpu.memory_space<vmem>>, vector<1x512xf32>
    %11 = vector.broadcast %10 : vector<1x512xf32> to vector<40x512xf32>
    %12 = arith.addf %9, %11 : vector<40x512xf32>
    %cst_11 = arith.constant 0.000000e+00 : f32
    %13 = vector.broadcast %cst_11 : f32 to vector<40x512xf32>
    %14 = arith.maximumf %12, %13 : vector<40x512xf32>
    %c0_12 = arith.constant 0 : index
    %c0_13 = arith.constant 0 : index
    %15 = vector.load %arg6[%c0_12, %c0_13] : memref<512x128xf32, #tpu.memory_space<vmem>>, vector<512x128xf32>
    %cst_14 = arith.constant dense<0.000000e+00> : vector<40x128xf32>
    %16 = tpu.matmul %14, %15, %cst_14 {dimension_numbers = #tpu.dot_dimension_numbers<[1], [0], [0], [1], [0, 0, 1, 1], [], []>} : vector<40x512xf32>, vector<512x128xf32>, vector<40x128xf32> -> vector<40x128xf32>
    %c0_15 = arith.constant 0 : index
    %c0_16 = arith.constant 0 : index
    %17 = vector.load %arg7[%c0_15, %c0_16] : memref<1x128xf32, #tpu.memory_space<vmem>>, vector<1x128xf32>
    %18 = vector.broadcast %17 : vector<1x128xf32> to vector<40x128xf32>
    %19 = arith.addf %16, %18 : vector<40x128xf32>
    %cst_17 = arith.constant 0.000000e+00 : f32
    %20 = vector.broadcast %cst_17 : f32 to vector<40x128xf32>
    %21 = arith.maximumf %19, %20 : vector<40x128xf32>
    %c0_18 = arith.constant 0 : index
    %c0_19 = arith.constant 0 : index
    %22 = vector.load %arg8[%c0_18, %c0_19] : memref<128x128xf32, #tpu.memory_space<vmem>>, vector<128x128xf32>
    %cst_20 = arith.constant dense<0.000000e+00> : vector<40x128xf32>
    %23 = tpu.matmul %21, %22, %cst_20 {dimension_numbers = #tpu.dot_dimension_numbers<[1], [0], [0], [1], [0, 0, 1, 1], [], []>} : vector<40x128xf32>, vector<128x128xf32>, vector<40x128xf32> -> vector<40x128xf32>
    %c0_21 = arith.constant 0 : index
    %c0_22 = arith.constant 0 : index
    %24 = vector.load %arg9[%c0_21, %c0_22] : memref<1x128xf32, #tpu.memory_space<vmem>>, vector<1x128xf32>
    %25 = vector.broadcast %24 : vector<1x128xf32> to vector<40x128xf32>
    %26 = arith.addf %23, %25 : vector<40x128xf32>
    %cst_23 = arith.constant 0.000000e+00 : f32
    %27 = vector.broadcast %cst_23 : f32 to vector<40x128xf32>
    %28 = arith.maximumf %26, %27 : vector<40x128xf32>
    %c0_24 = arith.constant 0 : index
    %c0_25 = arith.constant 0 : index
    %29 = vector.load %arg10[%c0_24, %c0_25] : memref<128x128xf32, #tpu.memory_space<vmem>>, vector<128x128xf32>
    %cst_26 = arith.constant dense<0.000000e+00> : vector<40x128xf32>
    %30 = tpu.matmul %28, %29, %cst_26 {dimension_numbers = #tpu.dot_dimension_numbers<[1], [0], [0], [1], [0, 0, 1, 1], [], []>} : vector<40x128xf32>, vector<128x128xf32>, vector<40x128xf32> -> vector<40x128xf32>
    %c0_27 = arith.constant 0 : index
    %c0_28 = arith.constant 0 : index
    %31 = vector.load %arg11[%c0_27, %c0_28] : memref<1x128xf32, #tpu.memory_space<vmem>>, vector<1x128xf32>
    %32 = vector.broadcast %31 : vector<1x128xf32> to vector<40x128xf32>
    %33 = arith.addf %30, %32 : vector<40x128xf32>
    %34 = arith.negf %33 : vector<40x128xf32>
    %35 = math.exp %34 : vector<40x128xf32>
    %cst_29 = arith.constant 1.000000e+00 : f32
    %36 = vector.broadcast %cst_29 : f32 to vector<40x128xf32>
    %37 = arith.addf %36, %35 : vector<40x128xf32>
    %38 = arith.divf %36, %37 : vector<40x128xf32>
    %c0_30 = arith.constant 0 : index
    %c0_31 = arith.constant 0 : index
    %39 = vector.load %arg12[%c0_30, %c0_31] : memref<40x128xf32, #tpu.memory_space<vmem>>, vector<40x128xf32>
    tpu.vector_store %arg12[%c0_30, %c0_31], %38 {strides = array<i32>} : memref<40x128xf32, #tpu.memory_space<vmem>>, vector<40x128xf32>,
    return
  }
  func.func @transform_0(%arg0: i32) -> (i32, i32) {
    %c0_i32 = arith.constant 0 : i32
    %c0_i32_0 = arith.constant 0 : i32
    return %arg0, %c0_i32 : i32, i32
  }
  func.func @transform_1(%arg0: i32) -> (i32, i32) {
    %c0_i32 = arith.constant 0 : i32
    %c0_i32_0 = arith.constant 0 : i32
    %c0_i32_1 = arith.constant 0 : i32
    return %c0_i32, %c0_i32_0 : i32, i32
  }
  func.func @transform_2(%arg0: i32) -> (i32, i32) {
    %c0_i32 = arith.constant 0 : i32
    %c0_i32_0 = arith.constant 0 : i32
    %c0_i32_1 = arith.constant 0 : i32
    return %c0_i32, %c0_i32_0 : i32, i32
  }
  func.func @transform_3(%arg0: i32) -> (i32, i32) {
    %c0_i32 = arith.constant 0 : i32
    %c0_i32_0 = arith.constant 0 : i32
    %c0_i32_1 = arith.constant 0 : i32
    return %c0_i32, %c0_i32_0 : i32, i32
  }
  func.func @transform_4(%arg0: i32) -> (i32, i32) {
    %c0_i32 = arith.constant 0 : i32
    %c0_i32_0 = arith.constant 0 : i32
    %c0_i32_1 = arith.constant 0 : i32
    return %c0_i32, %c0_i32_0 : i32, i32
  }
  func.func @transform_5(%arg0: i32) -> (i32, i32) {
    %c0_i32 = arith.constant 0 : i32
    %c0_i32_0 = arith.constant 0 : i32
    %c0_i32_1 = arith.constant 0 : i32
    return %c0_i32, %c0_i32_0 : i32, i32
  }
  func.func @transform_6(%arg0: i32) -> (i32, i32) {
    %c0_i32 = arith.constant 0 : i32
    %c0_i32_0 = arith.constant 0 : i32
    %c0_i32_1 = arith.constant 0 : i32
    return %c0_i32, %c0_i32_0 : i32, i32
  }
  func.func @transform_7(%arg0: i32) -> (i32, i32) {
    %c0_i32 = arith.constant 0 : i32
    %c0_i32_0 = arith.constant 0 : i32
    %c0_i32_1 = arith.constant 0 : i32
    return %c0_i32, %c0_i32_0 : i32, i32
  }
  func.func @transform_8(%arg0: i32) -> (i32, i32) {
    %c0_i32 = arith.constant 0 : i32
    %c0_i32_0 = arith.constant 0 : i32
    %c0_i32_1 = arith.constant 0 : i32
    return %c0_i32, %c0_i32_0 : i32, i32
  }
  func.func @transform_9(%arg0: i32) -> (i32, i32) {
    %c0_i32 = arith.constant 0 : i32
    %c0_i32_0 = arith.constant 0 : i32
    %c0_i32_1 = arith.constant 0 : i32
    return %c0_i32, %c0_i32_0 : i32, i32
  }
  func.func @transform_10(%arg0: i32) -> (i32, i32) {
    %c0_i32 = arith.constant 0 : i32
    %c0_i32_0 = arith.constant 0 : i32
    %c0_i32_1 = arith.constant 0 : i32
    return %c0_i32, %c0_i32_0 : i32, i32
  }
  func.func @transform_11(%arg0: i32) -> (i32, i32) {
    %c0_i32 = arith.constant 0 : i32
    %c0_i32_0 = arith.constant 0 : i32
    return %arg0, %c0_i32 : i32, i32
  }
}

</mosaic_0001>

<bundles_post_ra>
// kernel: tpu_custom_call.1
= control target key start
LH: loop header
LB: loop body
LE: loop exit
PB: predicated region body
PF: predicated region fallthrough
CT: control target
= control target key end

     0   :  { %16 = vsyncpa [#allocation3], 0  ;;  %s2146_s0 = inlined_call_operand.hbm [shape: f32[40,128], index: 0, kind: input, shape index: {}]   ;;  %s2147_s1 = inlined_call_operand.hbm [shape: f32[128,128], index: 1, kind: input, shape index: {}]   ;;  %s2148_s2 = inlined_call_operand.vmem [shape: f32[1,128], index: 2, kind: input, shape index: {}]   ;;  %s2149_s3 = inlined_call_operand.hbm [shape: f32[128,512], index: 3, kind: input, shape index: {}]   ;;  %s2150_s4 = inlined_call_operand.vmem [shape: f32[1,512], index: 4, kind: input, shape index: {}]   ;;  %s2151_s5 = inlined_call_operand.hbm [shape: f32[512,128], index: 5, kind: input, shape index: {}]   ;;  %s2152_s6 = inlined_call_operand.vmem [shape: f32[1,128], index: 6, kind: input, shape index: {}]   ;;  %s2153_s7 = inlined_call_operand.hbm [shape: f32[128,128], index: 7, kind: input, shape index: {}]   ;;  %s2154_s8 = inlined_call_operand.vmem [shape: f32[1,128], index: 8, kind: input, shape index: {}]   ;;  %s2155_s9 = inlined_call_operand.hbm [shape: f32[128,128], index: 9, kind: input, shape index: {}]   ;;  %s2156_s10 = inlined_call_operand.vmem [shape: f32[1,128], index: 10, kind: input, shape index: {}]   ;;  %s2157_s11 = inlined_call_operand.hbm [shape: f32[40,128], index: 11, kind: output, shape index: {}]  }
   0x1   :  { %17 = vsyncpa [#allocation6], 0 }
   0x2   :  { %18 = vsyncpa [#allocation9], 0 }
   0x3   :  { %19 = vsyncpa [#allocation12], 0 }
   0x4   :  { %20 = vsyncpa [#allocation4], 0  ;;  %s1803_s17 = smov [#allocation5]   ;;  %s1804_s19 = smov [#allocation8]  }
   0x5   :  { %s38_s18 = sshll.u32 %s1803_s17, 4  ;;  %s66_s20 = sshll.u32 %s1804_s19, 4  ;;  %s39_s18 = int_to_ptr.vmem [resolvable:$true] %s38_s18  ;;  %s1877_s20 = int_to_ptr.vmem [resolvable:$true] %s66_s20 }
   0x6   :  { %s1639_s23 = scalar_lea.hbm %s2147_s1, 2048 }
   0x7   :  { %p1640_p0 = scmp.ne.s32.totalorder %s2147_s1, %s1639_s23  ;;  %p1643_p1 = scmp.lt.u32.totalorder %s1639_s23, %s2147_s1 }
   0x9   :  { %p1645_p2 = pnand %p1643_p1, %p1640_p0 }
   0xb   :  { %1648 = shalt.err (!%p1645_p2)
}
   0xc   :  { %s1649_s28 = scalar_lea.vmem %s39_s18, 2048  ;;  %p1654_p4 = scmp.lt.s32.totalorder %s39_s18, %s39_s18 }
   0xd   :  { %p1650_p3 = scmp.ne.s32.totalorder %s39_s18, %s1649_s28  ;;  %p1655_p5 = scmp.lt.s32.totalorder %s1649_s28, %s1649_s28 }
   0xf   :  { %p1656_p6 = por %p1655_p5, %p1654_p4 }
  0x11   :  { %p1657_p7 = pnand %p1656_p6, %p1650_p3 }
  0x13   :  { %1660 = shalt.err (!%p1657_p7)
}
  0x14   :  { %s1805_s29 = smov 128   ;;  %s1806_s30 = smov 8  }
  0x15   :  { %44 = dma.hbm_to_vmem [thread:$0]  %s2147_s1, 2048, %s39_s18, [#allocation6], %s1805_s29, %s1805_s29, %s1806_s30  }
  0x16   :  { %s1661_s16 = scalar_lea.hbm %s2151_s5, 8192 }
  0x17   :  { %p1662_p8 = scmp.ne.s32.totalorder %s2151_s5, %s1661_s16  ;;  %p1665_p9 = scmp.lt.u32.totalorder %s1661_s16, %s2151_s5 }
  0x19   :  { %p1667_p10 = pnand %p1665_p9, %p1662_p8 }
  0x1b   :  { %1670 = shalt.err (!%p1667_p10)
}
  0x1c   :  { %s1671_s23 = scalar_lea.vmem %s1877_s20, 8192  ;;  %p1676_p12 = scmp.lt.s32.totalorder %s1877_s20, %s1877_s20 }
  0x1d   :  { %p1672_p11 = scmp.ne.s32.totalorder %s1877_s20, %s1671_s23  ;;  %p1677_p13 = scmp.lt.s32.totalorder %s1671_s23, %s1671_s23 }
  0x1f   :  { %p1678_p0 = por %p1677_p13, %p1676_p12 }
  0x21   :  { %p1679_p1 = pnand %p1678_p0, %p1672_p11 }
  0x23   :  { %1682 = shalt.err (!%p1679_p1)
}
  0x24   :  { %72 = dma.hbm_to_vmem [thread:$0]  %s2151_s5, 8192, %s1877_s20, [#allocation9], %s1805_s29, %s1805_s29, %s1806_s30  }
  0x25   :  { %s1807_s24 = smov [#allocation2]   ;;  %s1808_s26 = smov [#allocation7]  }
  0x26   :  { %s26_s25 = sshll.u32 %s1807_s24, 4  ;;  %s52_s27 = sshll.u32 %s1808_s26, 4  ;;  %s27_s25 = int_to_ptr.vmem [resolvable:$true] %s26_s25  ;;  %s1914_s27 = int_to_ptr.vmem [resolvable:$true] %s52_s27 }
  0x27   :  { %s1683_s13 = scalar_lea.hbm %s2146_s0, 640 }
  0x28   :  { %p1684_p2 = scmp.ne.s32.totalorder %s2146_s0, %s1683_s13  ;;  %p1687_p3 = scmp.lt.u32.totalorder %s1683_s13, %s2146_s0 }
  0x2a   :  { %p1689_p4 = pnand %p1687_p3, %p1684_p2 }
  0x2c   :  { %1692 = shalt.err (!%p1689_p4)
}
  0x2d   :  { %s1693_s5 = scalar_lea.vmem %s27_s25, 640  ;;  %p1698_p6 = scmp.lt.s32.totalorder %s27_s25, %s27_s25 }
  0x2e   :  { %p1694_p5 = scmp.ne.s32.totalorder %s27_s25, %s1693_s5  ;;  %p1699_p7 = scmp.lt.s32.totalorder %s1693_s5, %s1693_s5 }
  0x30   :  { %p1700_p8 = por %p1699_p7, %p1698_p6 }
  0x32   :  { %p1701_p9 = pnand %p1700_p8, %p1694_p5 }
  0x34   :  { %1704 = shalt.err (!%p1701_p9)
}
  0x35   :  { %32 = dma.hbm_to_vmem [thread:$0]  %s2146_s0, 640, %s27_s25, [#allocation3], %s1805_s29, %s1805_s29, %s1806_s30  }
  0x36   :  { %s1705_s23 = scalar_lea.hbm %s2149_s3, 8192 }
  0x37   :  { %p1706_p10 = scmp.ne.s32.totalorder %s2149_s3, %s1705_s23  ;;  %p1709_p11 = scmp.lt.u32.totalorder %s1705_s23, %s2149_s3 }
  0x39   :  { %p1711_p12 = pnand %p1709_p11, %p1706_p10 }
  0x3b   :  { %1714 = shalt.err (!%p1711_p12)
}
  0x3c   :  { %s1715_s28 = scalar_lea.vmem %s1914_s27, 8192  ;;  %p1720_p0 = scmp.lt.s32.totalorder %s1914_s27, %s1914_s27 }
  0x3d   :  { %p1716_p13 = scmp.ne.s32.totalorder %s1914_s27, %s1715_s28  ;;  %p1721_p1 = scmp.lt.s32.totalorder %s1715_s28, %s1715_s28 }
  0x3f   :  { %p1722_p2 = por %p1721_p1, %p1720_p0 }
  0x41   :  { %p1723_p3 = pnand %p1722_p2, %p1716_p13 }
  0x43   :  { %1726 = shalt.err (!%p1723_p3)
}
  0x44   :  { %s1809_s0 = smov 512   ;;  %s1810_s25 = smov 32  }
  0x45   :  { %58 = dma.hbm_to_vmem [thread:$0]  %s2149_s3, 8192, %s1914_s27, [#allocation6], %s1809_s0, %s1809_s0, %s1810_s25  }
  0x46   :  { %s1811_s14 = smov [#allocation10]   ;;  %s1812_s16 = smov [#allocation11]  }
  0x47   :  { %s80_s15 = sshll.u32 %s1811_s14, 4  ;;  %s94_s17 = sshll.u32 %s1812_s16, 4  ;;  %s81_s15 = int_to_ptr.vmem [resolvable:$true] %s80_s15  ;;  %s1948_s17 = int_to_ptr.vmem [resolvable:$true] %s94_s17 }
  0x48   :  { %s1727_s19 = scalar_lea.hbm %s2153_s7, 2048 }
  0x49   :  { %p1728_p4 = scmp.ne.s32.totalorder %s2153_s7, %s1727_s19  ;;  %p1731_p5 = scmp.lt.u32.totalorder %s1727_s19, %s2153_s7 }
  0x4b   :  { %p1733_p6 = pnand %p1731_p5, %p1728_p4 }
  0x4d   :  { %1736 = shalt.err (!%p1733_p6)
}
  0x4e   :  { %s1737_s3 = scalar_lea.vmem %s81_s15, 2048  ;;  %p1742_p8 = scmp.lt.s32.totalorder %s81_s15, %s81_s15 }
  0x4f   :  { %p1738_p7 = scmp.ne.s32.totalorder %s81_s15, %s1737_s3  ;;  %p1743_p9 = scmp.lt.s32.totalorder %s1737_s3, %s1737_s3 }
  0x51   :  { %p1744_p10 = por %p1743_p9, %p1742_p8 }
  0x53   :  { %p1745_p11 = pnand %p1744_p10, %p1738_p7 }
  0x55   :  { %1748 = shalt.err (!%p1745_p11)
}
  0x56   :  { %86 = dma.hbm_to_vmem [thread:$0]  %s2153_s7, 2048, %s81_s15, [#allocation9], %s1805_s29, %s1805_s29, %s1806_s30  }
  0x57   :  { %s1749_s28 = scalar_lea.hbm %s2155_s9, 2048 }
  0x58   :  { %p1750_p12 = scmp.ne.s32.totalorder %s2155_s9, %s1749_s28  ;;  %p1753_p13 = scmp.lt.u32.totalorder %s1749_s28, %s2155_s9 }
  0x5a   :  { %p1755_p0 = pnand %p1753_p13, %p1750_p12 }
  0x5c   :  { %1758 = shalt.err (!%p1755_p0)
}
  0x5d   :  { %s1759_s14 = scalar_lea.vmem %s1948_s17, 2048  ;;  %p1764_p2 = scmp.lt.s32.totalorder %s1948_s17, %s1948_s17 }
  0x5e   :  { %p1760_p1 = scmp.ne.s32.totalorder %s1948_s17, %s1759_s14  ;;  %p1765_p3 = scmp.lt.s32.totalorder %s1759_s14, %s1759_s14 }
  0x60   :  { %p1766_p4 = por %p1765_p3, %p1764_p2 }
  0x62   :  { %p1767_p5 = pnand %p1766_p4, %p1760_p1 }
  0x64   :  { %1770 = shalt.err (!%p1767_p5)
}
  0x65   :  { %100 = dma.hbm_to_vmem [thread:$0]  %s2155_s9, 2048, %s1948_s17, [#allocation12], %s1805_s29, %s1805_s29, %s1806_s30  }
  0x66   :  { %1793 = dma.done.wait [#allocation3], 640  }
  0x67   :  { %1794 = vsyncadd [#allocation3], 4294966656 }
  0x68   :  { %1795 = dma.done.wait [#allocation6], 10240  }
  0x69   :  { %1796 = vsyncadd [#allocation6], 4294957056 }
  0x6a   :  { %1797 = dma.done.wait [#allocation9], 10240  }
  0x6b   :  { %1798 = vsyncadd [#allocation9], 4294957056 }
  0x6c   :  { %1799 = dma.done.wait [#allocation12], 2048  }
  0x6d   :  { %1800 = vsyncadd [#allocation12], 4294965248  ;;  %v1813_v0 = vmov 0.0|0.0   ;;  %vm1814_vm0 = vmmov 0   ;;  %v1815_v1 = vmov 0.0   ;;  %v126_v2 = vld [vmem:[#allocation5] sm:$0xff] }
  0x6e   :  { %1389 = vmatprep.subr.bf16.mxu0 %v1813_v0  ;;  %1280 = vmatprep.mubr.msk.f32.mxu0 %vm1814_vm0, %v1815_v1  ;;  %v127_v3 = vld [vmem:[#allocation5 + $0x8] sm:$0xff]  ;;  %v128_v4 = vld [vmem:[#allocation5 + $0x10] sm:$0xff]  ;;  %v129_v6 = vld [vmem:[#allocation5 + $0x18] sm:$0xff] }
  0x6f   :  { %394 = vmatprep.mubr.f32.mxu1 %v1815_v1  ;;  %v1390_v5 = vpack.c.bf16 %v127_v3, %v126_v2  ;;  %v1393_v7 = vpack.c.bf16 %v129_v6, %v128_v4  ;;  %v130_v8 = vld [vmem:[#allocation5 + $0x20] sm:$0xff]  ;;  %v131_v9 = vld [vmem:[#allocation5 + $0x28] sm:$0xff]  ;;  %v132_v11 = vld [vmem:[#allocation5 + $0x30] sm:$0xff] }
  0x70   :  { %v1396_v10 = vpack.c.bf16 %v131_v9, %v130_v8  ;;  %v245_v12 = vld [vmem:[#allocation7 + $0x8] sm:$0xff]  ;;  %v133_v14 = vld [vmem:[#allocation5 + $0x38] sm:$0xff]  ;;  %v244_v16 = vld [vmem:[#allocation7] sm:$0xff] }
  0x71   :  { %1391 = vmatpush3.bf16.msra.mxu0 %v1390_v5  ;;  %v249_v13 = vld [vmem:[#allocation7 + $0x28] sm:$0xff]  ;;  %v248_v17 = vld [vmem:[#allocation7 + $0x20] sm:$0xff]  ;;  %v1399_v21 = vpack.c.bf16 %v133_v14, %v132_v11  ;;  %v136_v34 = vld [vmem:[#allocation5 + $0x50] sm:$0xff] }
  0x72   :  { %1392 = vmatprep.subr.bf16.mxu0 %v1813_v0  ;;  %v1413_v15 = vpack.c.bf16 %v249_v13, %v245_v12  ;;  %v1415_v18 = vpack.c.bf16 %v248_v17, %v244_v16  ;;  %v253_v19 = vld [vmem:[#allocation7 + $0x48] sm:$0xff]  ;;  %v134_v22 = vld [vmem:[#allocation5 + $0x40] sm:$0xff]  ;;  %v137_v38 = vld [vmem:[#allocation5 + $0x58] sm:$0xff] }
  0x73   :  { %v257_v20 = vld [vmem:[#allocation7 + $0x68] sm:$0xff]  ;;  %v252_v24 = vld [vmem:[#allocation7 + $0x40] sm:$0xff]  ;;  %v1405_v44 = vpack.c.bf16 %v137_v38, %v136_v34  ;;  %v140_v54 = vld [vmem:[#allocation5 + $0x70] sm:$0xff] }
  0x74   :  { %1414 = vmatprep.subr.bf16.mxu1 %v1413_v15  ;;  %v1417_v23 = vpack.c.bf16 %v257_v20, %v253_v19  ;;  %v256_v25 = vld [vmem:[#allocation7 + $0x60] sm:$0xff]  ;;  %v135_v26 = vld [vmem:[#allocation5 + $0x48] sm:$0xff]  ;;  %v141_v55 = vld [vmem:[#allocation5 + $0x78] sm:$0xff] }
  0x75   :  { %1394 = vmatpush3.bf16.msra.mxu0 %v1393_v7  ;;  %1416 = vmatpush1.bf16.msra.mxu1 %v1415_v18  ;;  %v1419_v27 = vpack.c.bf16 %v256_v25, %v252_v24  ;;  %v261_v28 = vld [vmem:[#allocation7 + $0x88] sm:$0xff]  ;;  %v260_v31 = vld [vmem:[#allocation7 + $0x80] sm:$0xff]  ;;  %v1402_v33 = vpack.c.bf16 %v135_v26, %v134_v22  ;;  %v247_v57 = vld [vmem:[#allocation7 + $0x18] sm:$0xff]  ;;  %v1411_v2 = vpack.c.bf16 %v141_v55, %v140_v54 }
  0x76   :  { %1395 = vmatprep.subr.bf16.mxu0 %v1813_v0  ;;  %v265_v29 = vld [vmem:[#allocation7 + $0xa8] sm:$0xff]  ;;  %1418 = vmatprep.subr.bf16.mxu1 %v1417_v23  ;;  %v264_v32 = vld [vmem:[#allocation7 + $0xa0] sm:$0xff]  ;;  %v251_v61 = vld [vmem:[#allocation7 + $0x38] sm:$0xff] }
  0x77   :  { %v1421_v30 = vpack.c.bf16 %v265_v29, %v261_v28  ;;  %v1423_v35 = vpack.c.bf16 %v264_v32, %v260_v31  ;;  %v269_v36 = vld [vmem:[#allocation7 + $0xc8] sm:$0xff]  ;;  %v268_v40 = vld [vmem:[#allocation7 + $0xc0] sm:$0xff]  ;;  %v1445_v4 = vpack.c.bf16 %v251_v61, %v247_v57  ;;  %v246_v5 = vld [vmem:[#allocation7 + $0x10] sm:$0xff] }
  0x78   :  { %v273_v37 = vld [vmem:[#allocation7 + $0xe8] sm:$0xff]  ;;  %v272_v41 = vld [vmem:[#allocation7 + $0xe0] sm:$0xff]  ;;  %v250_v6 = vld [vmem:[#allocation7 + $0x30] sm:$0xff] }
  0x79   :  { %1397 = vmatpush3.bf16.msra.mxu0 %v1396_v10  ;;  %1420 = vmatpush1.bf16.msra.mxu1 %v1419_v27  ;;  %v1425_v39 = vpack.c.bf16 %v273_v37, %v269_v36  ;;  %v277_v42 = vld [vmem:[#allocation7 + $0x108] sm:$0xff]  ;;  %v138_v45 = vld [vmem:[#allocation5 + $0x60] sm:$0xff]  ;;  %v1427_v46 = vpack.c.bf16 %v272_v41, %v268_v40  ;;  %v255_v7 = vld [vmem:[#allocation7 + $0x58] sm:$0xff]  ;;  %v1447_v13 = vpack.c.bf16 %v250_v6, %v246_v5 }
  0x7a   :  { %1398 = vmatprep.subr.bf16.mxu0 %v1813_v0  ;;  %1422 = vmatprep.subr.bf16.mxu1 %v1421_v30  ;;  %v281_v43 = vld [vmem:[#allocation7 + $0x128] sm:$0xff]  ;;  %v276_v49 = vld [vmem:[#allocation7 + $0x100] sm:$0xff]  ;;  %v259_v9 = vld [vmem:[#allocation7 + $0x78] sm:$0xff] }
  0x7b   :  { %v139_v47 = vld [vmem:[#allocation5 + $0x68] sm:$0xff]  ;;  %v1429_v48 = vpack.c.bf16 %v281_v43, %v277_v42  ;;  %v280_v50 = vld [vmem:[#allocation7 + $0x120] sm:$0xff]  ;;  %v121_v12 = vld [vmem:[#allocation2] sm:$0xff]  ;;  %v1449_v14 = vpack.c.bf16 %v259_v9, %v255_v7 }
  0x7c   :  { %v285_v51 = vld [vmem:[#allocation7 + $0x148] sm:$0xff]  ;;  %v1408_v53 = vpack.c.bf16 %v139_v47, %v138_v45  ;;  %v1431_v56 = vpack.c.bf16 %v280_v50, %v276_v49  ;;  %v284_v59 = vld [vmem:[#allocation7 + $0x140] sm:$0xff]  ;;  %v254_v15 = vld [vmem:[#allocation7 + $0x50] sm:$0xff] }
  0x7d   :  { %1400 = vmatpush3.bf16.msra.mxu0 %v1399_v21  ;;  %1424 = vmatpush1.bf16.msra.mxu1 %v1423_v35  ;;  %v289_v52 = vld [vmem:[#allocation7 + $0x168] sm:$0xff]  ;;  %v288_v60 = vld [vmem:[#allocation7 + $0x160] sm:$0xff]  ;;  %v258_v16 = vld [vmem:[#allocation7 + $0x70] sm:$0xff] }
  0x7e   :  { %1401 = vmatprep.subr.bf16.mxu0 %v1813_v0  ;;  %1426 = vmatprep.subr.bf16.mxu1 %v1425_v39  ;;  %v1433_v58 = vpack.c.bf16 %v289_v52, %v285_v51  ;;  %v293_v62 = vld [vmem:[#allocation7 + $0x188] sm:$0xff]  ;;  %v1435_v3 = vpack.c.bf16 %v288_v60, %v284_v59  ;;  %v292_v10 = vld [vmem:[#allocation7 + $0x180] sm:$0xff]  ;;  %v263_v18 = vld [vmem:[#allocation7 + $0x98] sm:$0xff]  ;;  %v1451_v21 = vpack.c.bf16 %v258_v16, %v254_v15 }
  0x7f   :  { %v297_v63 = vld [vmem:[#allocation7 + $0x1a8] sm:$0xff]  ;;  %v296_v11 = vld [vmem:[#allocation7 + $0x1a0] sm:$0xff]  ;;  %v267_v19 = vld [vmem:[#allocation7 + $0xb8] sm:$0xff] }
  0x80   :  { %v1437_v8 = vpack.c.bf16 %v297_v63, %v293_v62  ;;  %v1439_v17 = vpack.c.bf16 %v296_v11, %v292_v10  ;;  %v122_v20 = vld [vmem:[#allocation2 + $0x8] sm:$0xff]  ;;  %v1453_v22 = vpack.c.bf16 %v267_v19, %v263_v18  ;;  %v262_v23 = vld [vmem:[#allocation7 + $0x90] sm:$0xff]  ;;  %v271_v25 = vld [vmem:[#allocation7 + $0xd8] sm:$0xff] }
  0x81   :  { %1403 = vmatpush3.bf16.msra.mxu0 %v1402_v33  ;;  %1428 = vmatpush1.bf16.msra.mxu1 %v1427_v46  ;;  %v266_v24 = vld [vmem:[#allocation7 + $0xb0] sm:$0xff]  ;;  %v275_v26 = vld [vmem:[#allocation7 + $0xf8] sm:$0xff]  ;;  %v123_v27 = vld [vmem:[#allocation2 + $0x10] sm:$0xff] }
  0x82   :  { %1404 = vmatprep.subr.bf16.mxu0 %v1813_v0  ;;  %1430 = vmatprep.subr.bf16.mxu1 %v1429_v48  ;;  %v1455_v28 = vpack.c.bf16 %v266_v24, %v262_v23  ;;  %v1457_v29 = vpack.c.bf16 %v275_v26, %v271_v25  ;;  %v270_v30 = vld [vmem:[#allocation7 + $0xd0] sm:$0xff]  ;;  %v279_v32 = vld [vmem:[#allocation7 + $0x118] sm:$0xff]  ;;  %v305_v54 = vld [vmem:[#allocation7 + $0x1e8] sm:$0xff] }
  0x83   :  { %v274_v31 = vld [vmem:[#allocation7 + $0xf0] sm:$0xff]  ;;  %v283_v33 = vld [vmem:[#allocation7 + $0x138] sm:$0xff]  ;;  %v304_v59 = vld [vmem:[#allocation7 + $0x1e0] sm:$0xff] }
  0x84   :  { %v124_v34 = vld [vmem:[#allocation2 + $0x18] sm:$0xff]  ;;  %v1459_v35 = vpack.c.bf16 %v274_v31, %v270_v30  ;;  %v1461_v36 = vpack.c.bf16 %v283_v33, %v279_v32  ;;  %v287_v39 = vld [vmem:[#allocation7 + $0x158] sm:$0xff]  ;;  %v588_v5 = vld [vmem:[#allocation8 + $0x180] sm:$0xff] }
  0x85   :  { %1406 = vmatpush3.bf16.msra.mxu0 %v1405_v44  ;;  %1432 = vmatpush1.bf16.msra.mxu1 %v1431_v56  ;;  %v278_v37 = vld [vmem:[#allocation7 + $0x110] sm:$0xff]  ;;  %v291_v40 = vld [vmem:[#allocation7 + $0x178] sm:$0xff]  ;;  %v589_v7 = vld [vmem:[#allocation8 + $0x188] sm:$0xff] }
  0x86   :  { %1407 = vmatprep.subr.bf16.mxu0 %v1813_v0  ;;  %1434 = vmatprep.subr.bf16.mxu1 %v1433_v58  ;;  %v282_v38 = vld [vmem:[#allocation7 + $0x130] sm:$0xff]  ;;  %v125_v41 = vld [vmem:[#allocation2 + $0x20] sm:$0xff]  ;;  %v1465_v43 = vpack.c.bf16 %v291_v40, %v287_v39  ;;  %v300_v58 = vld [vmem:[#allocation7 + $0x1c0] sm:$0xff] }
  0x87   :  { %v1463_v42 = vpack.c.bf16 %v282_v38, %v278_v37  ;;  %v286_v44 = vld [vmem:[#allocation7 + $0x150] sm:$0xff]  ;;  %v295_v46 = vld [vmem:[#allocation7 + $0x198] sm:$0xff]  ;;  %v1443_v61 = vpack.c.bf16 %v304_v59, %v300_v58  ;;  %v540_v10 = vld [vmem:[#allocation8] sm:$0xff] }
  0x88   :  { %v290_v45 = vld [vmem:[#allocation7 + $0x170] sm:$0xff]  ;;  %v299_v47 = vld [vmem:[#allocation7 + $0x1b8] sm:$0xff]  ;;  %v541_v11 = vld [vmem:[#allocation8 + $0x8] sm:$0xff] }
  0x89   :  { %1409 = vmatpush3.bf16.msra.mxu0 %v1408_v53  ;;  %1436 = vmatpush1.bf16.msra.mxu1 %v1435_v3  ;;  %v1467_v48 = vpack.c.bf16 %v290_v45, %v286_v44  ;;  %v1469_v49 = vpack.c.bf16 %v299_v47, %v295_v46  ;;  %v294_v50 = vld [vmem:[#allocation7 + $0x190] sm:$0xff]  ;;  %v301_v53 = vld [vmem:[#allocation7 + $0x1c8] sm:$0xff]  ;;  %v303_v55 = vld [vmem:[#allocation7 + $0x1d8] sm:$0xff] }
  0x8a   :  { %1410 = vmatprep.subr.bf16.mxu0 %v1813_v0  ;;  %1438 = vmatprep.subr.bf16.mxu1 %v1437_v8  ;;  %v298_v51 = vld [vmem:[#allocation7 + $0x1b0] sm:$0xff]  ;;  %v1441_v56 = vpack.c.bf16 %v305_v54, %v301_v53  ;;  %v307_v57 = vld [vmem:[#allocation7 + $0x1f8] sm:$0xff]  ;;  %v556_v3 = vld [vmem:[#allocation8 + $0x80] sm:$0xff]  ;;  %v1509_v8 = vpack.c.bf16 %v589_v7, %v588_v5 }
  0x8b   :  { %v1471_v52 = vpack.c.bf16 %v298_v51, %v294_v50  ;;  %v1473_v60 = vpack.c.bf16 %v307_v57, %v303_v55  ;;  %v302_v62 = vld [vmem:[#allocation7 + $0x1d0] sm:$0xff]  ;;  %v2008_v9 = vld [vmem:[%s2148_s2] ss:$0 sm:$0xff]  ;;  %v560_v31 = vld [vmem:[#allocation8 + $0xa0] sm:$0xff] }
  0x8c   :  { %v306_v63 = vld [vmem:[#allocation7 + $0x1f0] sm:$0xff]  ;;  %v559_v18 = vld [vmem:[#allocation8 + $0x98] sm:$0xff]  ;;  %v544_v40 = vld [vmem:[#allocation8 + $0x20] sm:$0xff] }
  0x8d   :  { %1412 = vmatpush3.bf16.msra.mxu0 %v1411_v2  ;;  %1440 = vmatpush1.bf16.msra.mxu1 %v1439_v17  ;;  %v1475_v2 = vpack.c.bf16 %v306_v63, %v302_v62  ;;  %v558_v15 = vld [vmem:[#allocation8 + $0x90] sm:$0xff]  ;;  %v543_v25 = vld [vmem:[#allocation8 + $0x18] sm:$0xff]  ;;  %v576_v45 = vld [vmem:[#allocation8 + $0x120] sm:$0xff] }
  0x8e   :  { %1446 = vmatprep.subr.bf16.mxu0 %v1445_v4  ;;  %1442 = vmatprep.subr.bf16.mxu1 %v1441_v56  ;;  %v557_v4 = vld [vmem:[#allocation8 + $0x88] sm:$0xff]  ;;  %v590_v19 = vld [vmem:[#allocation8 + $0x190] sm:$0xff]  ;;  %v575_v30 = vld [vmem:[#allocation8 + $0x118] sm:$0xff] }
  0x8f   :  { %v1477_v6 = vpack.c.bf16 %v557_v4, %v556_v3  ;;  %v542_v24 = vld [vmem:[#allocation8 + $0x10] sm:$0xff]  ;;  %v577_v46 = vld [vmem:[#allocation8 + $0x128] sm:$0xff]  ;;  %v563_v50 = vld [vmem:[#allocation8 + $0xb8] sm:$0xff] }
  0x90   :  { %1281 = vmatmul.mubr.f32.vlgmr.msra.gmra.mrb[0].mxu0 %v121_v12  ;;  %v1483_v38 = vpack.c.bf16 %v543_v25, %v542_v24  ;;  %v562_v47 = vld [vmem:[#allocation8 + $0xb0] sm:$0xff]  ;;  %v1519_v55 = vpack.c.bf16 %v577_v46, %v576_v45  ;;  %v547_v57 = vld [vmem:[#allocation8 + $0x38] sm:$0xff]  ;;  %v564_v63 = vld [vmem:[#allocation8 + $0xc0] sm:$0xff] }
  0x91   :  { %1283 = vmatprep.mubr.msk.f32.mxu0 %vm1814_vm0, %v1815_v1  ;;  %1448 = vmatpush1.bf16.msra.mxu0 %v1447_v13  ;;  %v572_v13 = vld [vmem:[#allocation8 + $0x100] sm:$0xff]  ;;  %v594_v51 = vld [vmem:[#allocation8 + $0x1b0] sm:$0xff]  ;;  %v1489_v59 = vpack.c.bf16 %v563_v50, %v562_v47  ;;  %v579_v62 = vld [vmem:[#allocation8 + $0x138] sm:$0xff] }
  0x92   :  { %1450 = vmatprep.subr.bf16.mxu0 %v1449_v14  ;;  %1444 = vmatpush1.bf16.msra.mxu1 %v1443_v61  ;;  %v573_v14 = vld [vmem:[#allocation8 + $0x108] sm:$0xff]  ;;  %v546_v56 = vld [vmem:[#allocation8 + $0x30] sm:$0xff]  ;;  %v596_v5 = vld [vmem:[#allocation8 + $0x1c0] sm:$0xff] }
  0x93   :  { %1478 = vmatprep.subr.bf16.mxu1 %v1477_v6  ;;  %v1511_v23 = vpack.c.bf16 %v573_v14, %v572_v13  ;;  %v578_v61 = vld [vmem:[#allocation8 + $0x130] sm:$0xff]  ;;  %v565_v4 = vld [vmem:[#allocation8 + $0xc8] sm:$0xff]  ;;  %v571_v47 = vld [vmem:[#allocation8 + $0xf8] sm:$0xff] }
  0x94   :  { %1284 = vmatmul.mubr.f32.gmra.mrb[2].mxu0 %v122_v20  ;;  %v591_v20 = vld [vmem:[#allocation8 + $0x198] sm:$0xff]  ;;  %v597_v6 = vld [vmem:[#allocation8 + $0x1c8] sm:$0xff]  ;;  %v1493_v14 = vpack.c.bf16 %v565_v4, %v564_v63  ;;  %v570_v46 = vld [vmem:[#allocation8 + $0xf0] sm:$0xff] }
  0x95   :  { %1286 = vmatprep.mubr.msk.f32.mxu0 %vm1814_vm0, %v1815_v1  ;;  %1452 = vmatpush1.bf16.msra.mxu0 %v1451_v21  ;;  %v603_v50 = vld [vmem:[#allocation8 + $0x1f8] sm:$0xff] }
  0x96   :  { %1454 = vmatprep.subr.bf16.mxu0 %v1453_v22  ;;  %v1479_v22 = vpack.c.bf16 %v541_v11, %v540_v10  ;;  %v1523_v10 = vpack.c.bf16 %v579_v62, %v578_v61  ;;  %v548_v11 = vld [vmem:[#allocation8 + $0x40] sm:$0xff]  ;;  %v308_v62 = vld [vmem:[%s2150_s4] sm:$0xf] }
  0x98   :  { %1287 = vmatmul.mubr.f32.gmra.mrb[4].mxu0 %v123_v27  ;;  %v1481_v27 = vpack.c.bf16 %v559_v18, %v558_v15  ;;  %v1525_v15 = vpack.c.bf16 %v597_v6, %v596_v5  ;;  %v566_v18 = vld [vmem:[#allocation8 + $0xd0] sm:$0xff] }
  0x99   :  { %1289 = vmatprep.mubr.msk.f32.mxu0 %vm1814_vm0, %v1815_v1  ;;  %1456 = vmatpush1.bf16.msra.mxu0 %v1455_v28  ;;  %v1513_v28 = vpack.c.bf16 %v591_v20, %v590_v19 }
  0x9a   :  { %1458 = vmatprep.subr.bf16.mxu0 %v1457_v29  ;;  %v574_v29 = vld [vmem:[#allocation8 + $0x110] sm:$0xff] }
  0x9b   :  { %v1515_v39 = vpack.c.bf16 %v575_v30, %v574_v29  ;;  %v582_v30 = vld [vmem:[#allocation8 + $0x150] sm:$0xff] }
  0x9c   :  { %1290 = vmatmul.mubr.f32.gmra.mrb[6].mxu0 %v124_v34  ;;  %v561_v34 = vld [vmem:[#allocation8 + $0xa8] sm:$0xff] }
  0x9d   :  { %1292 = vmatprep.mubr.msk.f32.mxu0 %vm1814_vm0, %v1815_v1  ;;  %1460 = vmatpush1.bf16.msra.mxu0 %v1459_v35  ;;  %v592_v35 = vld [vmem:[#allocation8 + $0x1a0] sm:$0xff] }
  0x9e   :  { %1462 = vmatprep.subr.bf16.mxu0 %v1461_v36  ;;  %v593_v36 = vld [vmem:[#allocation8 + $0x1a8] sm:$0xff] }
  0x9f   :  { %v1517_v44 = vpack.c.bf16 %v593_v36, %v592_v35  ;;  %v601_v35 = vld [vmem:[#allocation8 + $0x1e8] sm:$0xff] }
  0xa0   :  { %1293 = vmatmul.mubr.f32.gmra.mrb[8].mxu0 %v125_v41  ;;  %v545_v41 = vld [vmem:[#allocation8 + $0x28] sm:$0xff] }
  0xa1   :  { %1464 = vmatpush1.bf16.msra.mxu0 %v1463_v42  ;;  %489 = vmatprep.mubr.f32.mxu0 %v1815_v1  ;;  %v1487_v54 = vpack.c.bf16 %v545_v41, %v544_v40  ;;  %v552_v40 = vld [vmem:[#allocation8 + $0x60] sm:$0xff]  ;;  %v553_v41 = vld [vmem:[#allocation8 + $0x68] sm:$0xff] }
  0xa2   :  { %1466 = vmatprep.subr.bf16.mxu0 %v1465_v43  ;;  %v1485_v43 = vpack.c.bf16 %v561_v34, %v560_v31  ;;  %v583_v31 = vld [vmem:[#allocation8 + $0x158] sm:$0xff]  ;;  %v600_v34 = vld [vmem:[#allocation8 + $0x1e0] sm:$0xff] }
  0xa5   :  { %1468 = vmatpush1.bf16.msra.mxu0 %v1467_v48 }
  0xa6   :  { %1470 = vmatprep.subr.bf16.mxu0 %v1469_v49 }
  0xa9   :  { %1472 = vmatpush1.bf16.msra.mxu0 %v1471_v52  ;;  %v595_v52 = vld [vmem:[#allocation8 + $0x1b8] sm:$0xff] }
  0xaa   :  { %1474 = vmatprep.subr.bf16.mxu0 %v1473_v60  ;;  %v1521_v60 = vpack.c.bf16 %v595_v52, %v594_v51  ;;  %v554_v51 = vld [vmem:[#allocation8 + $0x70] sm:$0xff]  ;;  %v555_v52 = vld [vmem:[#allocation8 + $0x78] sm:$0xff] }
  0xad   :  { %1476 = vmatpush1.bf16.msra.mxu0 %v1475_v2 }
  0xae   :  { %1510 = vmatprep.subr.bf16.mxu0 %v1509_v8  ;;  %v1491_v8 = vpack.c.bf16 %v547_v57, %v546_v56  ;;  %v587_v56 = vld [vmem:[#allocation8 + $0x178] sm:$0xff] }
 0x163   :  { %v215_v12 = vpop.f32.mrb[0].mxu0 }
 0x164   :  { %v216_v16 = vadd.f32 %v2008_v9, %v215_v12  ;;  %v1282_v17 = vpop.f32.mrb[1].mxu0  ;;  %v549_v12 = vld [vmem:[#allocation8 + $0x48] sm:$0xff] }
 0x165   :  { %v581_v17 = vld [vmem:[#allocation8 + $0x148] sm:$0xff]  ;;  %v1495_v25 = vpack.c.bf16 %v549_v12, %v548_v11 }
 0x166   :  { %v239_v21 = vmax.f32 %v216_v16, 0.0  ;;  %v580_v16 = vld [vmem:[#allocation8 + $0x140] sm:$0xff] }
 0x167   :  { %v220_v26 = vpop.f32.mrb[2].mxu0 }
 0x168   :  { %v221_v32 = vadd.f32 %v2008_v9, %v220_v26  ;;  %v1285_v33 = vpop.f32.mrb[3].mxu0  ;;  %395 = vmatmul.mubr.f32.vlgmr.msra.gmra.mrb[0].mxu1 %v239_v21  ;;  %490 = vmatmul.mubr.f32.vlgmr.msra.gmra.mrb[10].mxu0 %v239_v21  ;;  %v567_v21 = vld [vmem:[#allocation8 + $0xd8] sm:$0xff]  ;;  %v1527_v26 = vpack.c.bf16 %v581_v17, %v580_v16 }
 0x169   :  { %400 = vmatprep.mubr.f32.mxu1 %v1815_v1  ;;  %495 = vmatprep.mubr.f32.mxu0 %v1815_v1  ;;  %v569_v33 = vld [vmem:[#allocation8 + $0xe8] sm:$0xff] }
 0x16a   :  { %v240_v37 = vmax.f32 %v221_v32, 0.0  ;;  %1480 = vmatpush3.bf16.msra.mxu1 %v1479_v22  ;;  %1512 = vmatpush3.bf16.msra.mxu0 %v1511_v23  ;;  %v598_v22 = vld [vmem:[#allocation8 + $0x1d0] sm:$0xff]  ;;  %v599_v23 = vld [vmem:[#allocation8 + $0x1d8] sm:$0xff]  ;;  %v568_v32 = vld [vmem:[#allocation8 + $0xe0] sm:$0xff] }
 0x16b   :  { %v225_v42 = vpop.f32.mrb[4].mxu0  ;;  %1482 = vmatprep.subr.bf16.mxu1 %v1481_v27  ;;  %1514 = vmatprep.subr.bf16.mxu0 %v1513_v28  ;;  %v550_v27 = vld [vmem:[#allocation8 + $0x50] sm:$0xff]  ;;  %v551_v28 = vld [vmem:[#allocation8 + $0x58] sm:$0xff]  ;;  %v1529_v29 = vpack.c.bf16 %v599_v23, %v598_v22 }
 0x16c   :  { %v226_v48 = vadd.f32 %v2008_v9, %v225_v42  ;;  %v1288_v49 = vpop.f32.mrb[5].mxu0  ;;  %401 = vmatmul.mubr.f32.gmra.mrb[2].mxu1 %v240_v37  ;;  %496 = vmatmul.mubr.f32.gmra.mrb[12].mxu0 %v240_v37  ;;  %v1499_v36 = vpack.c.bf16 %v551_v28, %v550_v27  ;;  %v1531_v37 = vpack.c.bf16 %v583_v31, %v582_v30  ;;  %v584_v42 = vld [vmem:[#allocation8 + $0x160] sm:$0xff] }
 0x16d   :  { %406 = vmatprep.mubr.f32.mxu1 %v1815_v1  ;;  %501 = vmatprep.mubr.f32.mxu0 %v1815_v1  ;;  %v1505_v49 = vpack.c.bf16 %v571_v47, %v570_v46 }
 0x16e   :  { %v241_v53 = vmax.f32 %v226_v48, 0.0  ;;  %1484 = vmatpush3.bf16.msra.mxu1 %v1483_v38  ;;  %1516 = vmatpush3.bf16.msra.mxu0 %v1515_v39  ;;  %v1501_v38 = vpack.c.bf16 %v569_v33, %v568_v32  ;;  %v1533_v39 = vpack.c.bf16 %v601_v35, %v600_v34  ;;  %v602_v48 = vld [vmem:[#allocation8 + $0x1f0] sm:$0xff] }
 0x16f   :  { %v230_v58 = vpop.f32.mrb[6].mxu0  ;;  %1486 = vmatprep.subr.bf16.mxu1 %v1485_v43  ;;  %1518 = vmatprep.subr.bf16.mxu0 %v1517_v44  ;;  %v1503_v43 = vpack.c.bf16 %v553_v41, %v552_v40  ;;  %v585_v44 = vld [vmem:[#allocation8 + $0x168] sm:$0xff] }
 0x170   :  { %v231_v2 = vadd.f32 %v2008_v9, %v230_v58  ;;  %v1291_v3 = vpop.f32.mrb[7].mxu0  ;;  %407 = vmatmul.mubr.f32.gmra.mrb[4].mxu1 %v241_v53  ;;  %502 = vmatmul.mubr.f32.gmra.mrb[14].mxu0 %v241_v53  ;;  %v1535_v45 = vpack.c.bf16 %v585_v44, %v584_v42  ;;  %v1537_v53 = vpack.c.bf16 %v603_v50, %v602_v48  ;;  %v310_v58 = vlaneseq  ;;  %v801_v44 = vld [vmem:[#allocation10 + $0x28] sm:$0xff] }
 0x171   :  { %412 = vmatprep.mubr.f32.mxu1 %v1815_v1  ;;  %507 = vmatprep.mubr.f32.mxu0 %v1815_v1 }
 0x172   :  { %v242_v7 = vmax.f32 %v231_v2, 0.0  ;;  %1488 = vmatpush3.bf16.msra.mxu1 %v1487_v54  ;;  %1520 = vmatpush3.bf16.msra.mxu0 %v1519_v55  ;;  %v1507_v54 = vpack.c.bf16 %v555_v52, %v554_v51  ;;  %v586_v55 = vld [vmem:[#allocation8 + $0x170] sm:$0xff] }
 0x173   :  { %v235_v13 = vpop.f32.mrb[8].mxu0  ;;  %1490 = vmatprep.subr.bf16.mxu1 %v1489_v59  ;;  %1522 = vmatprep.subr.bf16.mxu0 %v1521_v60  ;;  %v1539_v57 = vpack.c.bf16 %v587_v56, %v586_v55  ;;  %v311_v59 = vshrl.u32 %v310_v58, 7  ;;  %v802_v58 = vld [vmem:[#allocation10 + $0x30] sm:$0xff] }
 0x174   :  { %v236_v19 = vadd.f32 %v2008_v9, %v235_v13  ;;  %v1294_v20 = vpop.f32.mrb[9].mxu0  ;;  %413 = vmatmul.mubr.f32.gmra.mrb[6].mxu1 %v242_v7  ;;  %508 = vmatmul.mubr.f32.gmra.mrb[16].mxu0 %v242_v7  ;;  %v1497_v9 = vpack.c.bf16 %v567_v21, %v566_v18 }
 0x175   :  { %418 = vmatprep.mubr.f32.mxu1 %v1815_v1  ;;  %513 = vmatprep.mubr.f32.mxu0 %v1815_v1  ;;  %v312_v60 = vsub.s32 0, %v311_v59  ;;  %v320_v61 = vsub.s32 2, %v311_v59  ;;  %v316_v63 = vsub.s32 1, %v311_v59  ;;  %v324_v2 = vsub.s32 3, %v311_v59  ;;  %v803_v59 = vld [vmem:[#allocation10 + $0x38] sm:$0xff] }
 0x176   :  { %v243_v24 = vmax.f32 %v236_v19, 0.0  ;;  %1492 = vmatpush3.bf16.msra.mxu1 %v1491_v8  ;;  %1524 = vmatpush3.bf16.msra.mxu0 %v1523_v10 }
 0x177   :  { %1494 = vmatprep.subr.bf16.mxu1 %v1493_v14  ;;  %1526 = vmatprep.subr.bf16.mxu0 %v1525_v15  ;;  %v2028_v3 = vrot.slane %v308_v62, %v312_v60  ;;  %v2030_v4 = vrot.slane %v308_v62, %v320_v61  ;;  %v2032_v5 = vrot.slane %v308_v62, %v316_v63  ;;  %v796_v14 = vld [vmem:[#allocation10] sm:$0xff]  ;;  %v797_v15 = vld [vmem:[#allocation10 + $0x8] sm:$0xff] }
 0x178   :  { %419 = vmatmul.mubr.f32.gmra.mrb[8].mxu1 %v243_v24  ;;  %514 = vmatmul.mubr.f32.gmra.mrb[18].mxu0 %v243_v24  ;;  %v2034_v6 = vrot.slane %v308_v62, %v324_v2  ;;  %v1542_v22 = vpack.c.bf16 %v797_v15, %v796_v14 }
 0x17a   :  { %1496 = vmatpush3.bf16.msra.mxu1 %v1495_v25  ;;  %1528 = vmatpush3.bf16.msra.mxu0 %v1527_v26 }
 0x17b   :  { %1498 = vmatprep.subr.bf16.mxu1 %v1497_v9  ;;  %1530 = vmatprep.subr.bf16.mxu0 %v1529_v29  ;;  %v798_v9 = vld [vmem:[#allocation10 + $0x10] sm:$0xff]  ;;  %v799_v29 = vld [vmem:[#allocation10 + $0x18] sm:$0xff] }
 0x17e   :  { %1500 = vmatpush3.bf16.msra.mxu1 %v1499_v36  ;;  %1532 = vmatpush3.bf16.msra.mxu0 %v1531_v37  ;;  %v1545_v36 = vpack.c.bf16 %v799_v29, %v798_v9  ;;  %v914_v29 = vld [vmem:[#allocation11] sm:$0xff] }
 0x17f   :  { %1502 = vmatprep.subr.bf16.mxu1 %v1501_v38  ;;  %1534 = vmatprep.subr.bf16.mxu0 %v1533_v39 }
 0x182   :  { %1504 = vmatpush3.bf16.msra.mxu1 %v1503_v43  ;;  %1536 = vmatpush3.bf16.msra.mxu0 %v1535_v45  ;;  %v800_v43 = vld [vmem:[#allocation10 + $0x20] sm:$0xff] }
 0x183   :  { %1506 = vmatprep.subr.bf16.mxu1 %v1505_v49  ;;  %1538 = vmatprep.subr.bf16.mxu0 %v1537_v53  ;;  %v1548_v51 = vpack.c.bf16 %v801_v44, %v800_v43  ;;  %v924_v44 = vld [vmem:[#allocation11 + $0x50] sm:$0xff] }
 0x186   :  { %1508 = vmatpush3.bf16.msra.mxu1 %v1507_v54  ;;  %1540 = vmatpush3.bf16.msra.mxu0 %v1539_v57 }
 0x187   :  { %1541 = vmatprep.subr.bf16.mxu1 %v1813_v0  ;;  %1565 = vmatprep.subr.bf16.mxu0 %v1813_v0 }
 0x23b   :  { %v396_v7 = vpop.f32.mrb[0].mxu1  ;;  %v491_v8 = vpop.f32.mrb[10].mxu0 }
 0x23c   :  { %v397_v10 = vadd.f32 %v396_v7, %v2028_v3  ;;  %v492_v11 = vadd.f32 %v491_v8, %v2030_v4  ;;  %v398_v12 = vpop.f32.mrb[1].mxu1  ;;  %v493_v13 = vpop.f32.mrb[11].mxu0  ;;  %v1551_v8 = vpack.c.bf16 %v803_v59, %v802_v58 }
 0x23d   :  { %v399_v16 = vadd.f32 %v398_v12, %v2032_v5  ;;  %v494_v17 = vadd.f32 %v493_v13, %v2034_v6 }
 0x23e   :  { %v520_v23 = vmax.f32 %v397_v10, 0.0  ;;  %v522_v24 = vmax.f32 %v492_v11, 0.0 }
 0x23f   :  { %v521_v18 = vmax.f32 %v399_v16, 0.0  ;;  %v523_v19 = vmax.f32 %v494_v17, 0.0  ;;  %v402_v20 = vpop.f32.mrb[2].mxu1  ;;  %v497_v21 = vpop.f32.mrb[12].mxu0  ;;  %v804_v16 = vld [vmem:[#allocation10 + $0x40] sm:$0xff]  ;;  %v805_v17 = vld [vmem:[#allocation10 + $0x48] sm:$0xff] }
 0x240   :  { %v403_v25 = vadd.f32 %v402_v20, %v2028_v3  ;;  %v498_v26 = vadd.f32 %v497_v21, %v2030_v4  ;;  %v404_v27 = vpop.f32.mrb[3].mxu1  ;;  %v499_v28 = vpop.f32.mrb[13].mxu0 }
 0x241   :  { %v405_v30 = vadd.f32 %v404_v27, %v2032_v5  ;;  %v500_v31 = vadd.f32 %v499_v28, %v2034_v6  ;;  %675 = vmatprep.mubr.f32.mxu1 %v521_v18  ;;  %765 = vmatprep.mubr.f32.mxu0 %v523_v19  ;;  %v810_v27 = vld [vmem:[#allocation10 + $0x70] sm:$0xff]  ;;  %v811_v28 = vld [vmem:[#allocation10 + $0x78] sm:$0xff] }
 0x242   :  { %676 = vmatmul.mubr.f32.vlgmr.msra.gmra.mrb[10].mxu1 %v520_v23  ;;  %766 = vmatmul.mubr.f32.vlgmr.msra.gmra.mrb[20].mxu0 %v522_v24  ;;  %v524_v37 = vmax.f32 %v403_v25, 0.0  ;;  %v526_v38 = vmax.f32 %v498_v26, 0.0  ;;  %v806_v23 = vld [vmem:[#allocation10 + $0x50] sm:$0xff]  ;;  %v807_v24 = vld [vmem:[#allocation10 + $0x58] sm:$0xff]  ;;  %v809_v25 = vld [vmem:[#allocation10 + $0x68] sm:$0xff]  ;;  %v1563_v9 = vpack.c.bf16 %v811_v28, %v810_v27 }
 0x243   :  { %v525_v32 = vmax.f32 %v405_v30, 0.0  ;;  %v527_v33 = vmax.f32 %v500_v31, 0.0  ;;  %v408_v34 = vpop.f32.mrb[4].mxu1  ;;  %v503_v35 = vpop.f32.mrb[14].mxu0  ;;  %1543 = vmatpush3.bf16.msra.mxu1 %v1542_v22  ;;  %v915_v30 = vld [vmem:[#allocation11 + $0x8] sm:$0xff]  ;;  %v916_v31 = vld [vmem:[#allocation11 + $0x10] sm:$0xff] }
 0x244   :  { %v409_v39 = vadd.f32 %v408_v34, %v2028_v3  ;;  %v504_v40 = vadd.f32 %v503_v35, %v2030_v4  ;;  %v410_v41 = vpop.f32.mrb[5].mxu1  ;;  %v505_v42 = vpop.f32.mrb[15].mxu0  ;;  %1544 = vmatprep.subr.bf16.mxu1 %v1813_v0  ;;  %v918_v35 = vld [vmem:[#allocation11 + $0x20] sm:$0xff] }
 0x245   :  { %v411_v45 = vadd.f32 %v410_v41, %v2032_v5  ;;  %v506_v46 = vadd.f32 %v505_v42, %v2034_v6  ;;  %680 = vmatprep.mubr.f32.mxu1 %v525_v32  ;;  %770 = vmatprep.mubr.f32.mxu0 %v527_v33  ;;  %v1566_v32 = vpack.c.bf16 %v915_v30, %v914_v29  ;;  %v917_v33 = vld [vmem:[#allocation11 + $0x18] sm:$0xff]  ;;  %v922_v41 = vld [vmem:[#allocation11 + $0x40] sm:$0xff]  ;;  %v923_v42 = vld [vmem:[#allocation11 + $0x48] sm:$0xff] }
 0x246   :  { %681 = vmatmul.mubr.f32.gmra.mrb[12].mxu1 %v524_v37  ;;  %771 = vmatmul.mubr.f32.gmra.mrb[22].mxu0 %v526_v38  ;;  %v528_v52 = vmax.f32 %v409_v39, 0.0  ;;  %v530_v53 = vmax.f32 %v504_v40, 0.0  ;;  %v2068_v34 = vpack.c.bf16 %v917_v33, %v916_v31  ;;  %v920_v38 = vld [vmem:[#allocation11 + $0x30] sm:$0xff]  ;;  %v921_v39 = vld [vmem:[#allocation11 + $0x38] sm:$0xff]  ;;  %v2080_v43 = vpack.c.bf16 %v923_v42, %v922_v41 }
 0x247   :  { %v529_v47 = vmax.f32 %v411_v45, 0.0  ;;  %v531_v48 = vmax.f32 %v506_v46, 0.0  ;;  %v414_v49 = vpop.f32.mrb[6].mxu1  ;;  %v509_v50 = vpop.f32.mrb[16].mxu0  ;;  %1546 = vmatpush3.bf16.msra.mxu1 %v1545_v36  ;;  %1567 = vmatpush3.bf16.msra.mxu0 %v1566_v32  ;;  %v919_v36 = vld [vmem:[#allocation11 + $0x28] sm:$0xff]  ;;  %v2076_v40 = vpack.c.bf16 %v921_v39, %v920_v38  ;;  %v925_v45 = vld [vmem:[#allocation11 + $0x58] sm:$0xff] }
 0x248   :  { %v415_v54 = vadd.f32 %v414_v49, %v2028_v3  ;;  %v510_v55 = vadd.f32 %v509_v50, %v2030_v4  ;;  %v416_v56 = vpop.f32.mrb[7].mxu1  ;;  %v511_v57 = vpop.f32.mrb[17].mxu0  ;;  %1547 = vmatprep.subr.bf16.mxu1 %v1813_v0  ;;  %1568 = vmatprep.subr.bf16.mxu0 %v1813_v0  ;;  %v2072_v37 = vpack.c.bf16 %v919_v36, %v918_v35  ;;  %v929_v35 = vld [vmem:[#allocation11 + $0x78] sm:$0xff] }
 0x249   :  { %v417_v60 = vadd.f32 %v416_v56, %v2032_v5  ;;  %v512_v61 = vadd.f32 %v511_v57, %v2034_v6  ;;  %685 = vmatprep.mubr.f32.mxu1 %v529_v47  ;;  %775 = vmatprep.mubr.f32.mxu0 %v531_v48  ;;  %v2084_v46 = vpack.c.bf16 %v925_v45, %v924_v44  ;;  %v926_v47 = vld [vmem:[#allocation11 + $0x60] sm:$0xff]  ;;  %v927_v48 = vld [vmem:[#allocation11 + $0x68] sm:$0xff] }
 0x24a   :  { %686 = vmatmul.mubr.f32.gmra.mrb[14].mxu1 %v528_v52  ;;  %776 = vmatmul.mubr.f32.gmra.mrb[24].mxu0 %v530_v53  ;;  %v532_v10 = vmax.f32 %v415_v54, 0.0  ;;  %v534_v11 = vmax.f32 %v510_v55, 0.0  ;;  %v2088_v49 = vpack.c.bf16 %v927_v48, %v926_v47  ;;  %v1083_v52 = vld [vmem:[%s2152_s6] ss:$0 sm:$0xff] }
 0x24b   :  { %v533_v62 = vmax.f32 %v417_v60, 0.0  ;;  %v535_v63 = vmax.f32 %v512_v61, 0.0  ;;  %v420_v2 = vpop.f32.mrb[8].mxu1  ;;  %v515_v7 = vpop.f32.mrb[18].mxu0  ;;  %1549 = vmatpush3.bf16.msra.mxu1 %v1548_v51  ;;  %1570 = vmatpush3.bf16.msra.mxu0 %v2068_v34 }
 0x24c   :  { %v421_v12 = vadd.f32 %v420_v2, %v2028_v3  ;;  %v516_v13 = vadd.f32 %v515_v7, %v2030_v4  ;;  %v422_v14 = vpop.f32.mrb[9].mxu1  ;;  %v517_v15 = vpop.f32.mrb[19].mxu0  ;;  %1550 = vmatprep.subr.bf16.mxu1 %v1813_v0  ;;  %v1554_v3 = vpack.c.bf16 %v805_v17, %v804_v16  ;;  %1571 = vmatprep.subr.bf16.mxu0 %v1813_v0 }
 0x24d   :  { %v423_v18 = vadd.f32 %v422_v14, %v2032_v5  ;;  %v518_v19 = vadd.f32 %v517_v15, %v2034_v6  ;;  %690 = vmatprep.mubr.f32.mxu1 %v533_v62  ;;  %780 = vmatprep.mubr.f32.mxu0 %v535_v63  ;;  %v1557_v5 = vpack.c.bf16 %v807_v24, %v806_v23  ;;  %v808_v6 = vld [vmem:[#allocation10 + $0x60] sm:$0xff] }
 0x24e   :  { %691 = vmatmul.mubr.f32.gmra.mrb[16].mxu1 %v532_v10  ;;  %781 = vmatmul.mubr.f32.gmra.mrb[26].mxu0 %v534_v11  ;;  %v536_v22 = vmax.f32 %v421_v12, 0.0  ;;  %v538_v4 = vmax.f32 %v516_v13, 0.0  ;;  %v1560_v26 = vpack.c.bf16 %v809_v25, %v808_v6 }
 0x24f   :  { %v537_v20 = vmax.f32 %v423_v18, 0.0  ;;  %v539_v21 = vmax.f32 %v518_v19, 0.0  ;;  %1552 = vmatpush3.bf16.msra.mxu1 %v1551_v8  ;;  %1573 = vmatpush3.bf16.msra.mxu0 %v2072_v37 }
 0x250   :  { %1553 = vmatprep.subr.bf16.mxu1 %v1813_v0  ;;  %1574 = vmatprep.subr.bf16.mxu0 %v1813_v0 }
 0x251   :  { %695 = vmatprep.mubr.f32.mxu1 %v537_v20  ;;  %785 = vmatprep.mubr.f32.mxu0 %v539_v21 }
 0x252   :  { %696 = vmatmul.mubr.f32.gmra.mrb[18].mxu1 %v536_v22  ;;  %786 = vmatmul.mubr.f32.gmra.mrb[28].mxu0 %v538_v4 }
 0x253   :  { %1555 = vmatpush3.bf16.msra.mxu1 %v1554_v3  ;;  %1327 = vmatprep.mubr.msk.f32.mxu1 %vm1814_vm0, %v1815_v1 }
 0x254   :  { %1556 = vmatprep.subr.bf16.mxu1 %v1813_v0  ;;  %1374 = vmatprep.mubr.msk.f32.mxu0 %vm1814_vm0, %v1815_v1 }
 0x255   :  { %1576 = vmatpush3.bf16.msra.mxu0 %v2076_v40 }
 0x256   :  { %1577 = vmatprep.subr.bf16.mxu0 %v1813_v0 }
 0x257   :  { %1558 = vmatpush3.bf16.msra.mxu1 %v1557_v5 }
 0x258   :  { %1559 = vmatprep.subr.bf16.mxu1 %v1813_v0 }
 0x259   :  { %1579 = vmatpush3.bf16.msra.mxu0 %v2080_v43 }
 0x25a   :  { %1580 = vmatprep.subr.bf16.mxu0 %v1813_v0 }
 0x25b   :  { %1561 = vmatpush3.bf16.msra.mxu1 %v1560_v26 }
 0x25c   :  { %1562 = vmatprep.subr.bf16.mxu1 %v1813_v0 }
 0x25d   :  { %1582 = vmatpush3.bf16.msra.mxu0 %v2084_v46 }
 0x25e   :  { %1583 = vmatprep.subr.bf16.mxu0 %v1813_v0 }
 0x25f   :  { %1564 = vmatpush3.bf16.msra.mxu1 %v1563_v9 }
 0x260   :  { %1589 = vmatprep.subr.bf16.mxu1 %v1813_v0 }
 0x261   :  { %1585 = vmatpush3.bf16.msra.mxu0 %v2088_v49 }
 0x262   :  { %1586 = vmatprep.subr.bf16.mxu0 %v1813_v0 }
 0x315   :  { %v1144_v50 = vpop.f32.mrb[10].mxu1  ;;  %v1191_v51 = vpop.f32.mrb[20].mxu0 }
 0x316   :  { %v1145_v53 = vpop.f32.mrb[11].mxu1  ;;  %v1192_v54 = vpop.f32.mrb[21].mxu0 }
 0x317   :  { %v1146_v55 = vadd.f32 %v1145_v53, %v1144_v50  ;;  %v1193_v56 = vadd.f32 %v1192_v54, %v1191_v51 }
 0x319   :  { %v678_v57 = vadd.f32 %v1146_v55, %v1083_v52  ;;  %v1147_v58 = vpop.f32.mrb[12].mxu1  ;;  %v1194_v59 = vpop.f32.mrb[22].mxu0 }
 0x31a   :  { %v1148_v60 = vpop.f32.mrb[13].mxu1  ;;  %v1195_v61 = vpop.f32.mrb[23].mxu0 }
 0x31b   :  { %v768_v62 = vadd.f32 %v1193_v56, %v678_v57  ;;  %v1149_v63 = vadd.f32 %v1148_v60, %v1147_v58  ;;  %v1196_v2 = vadd.f32 %v1195_v61, %v1194_v59  ;;  %v1085_v57 = vld [vmem:[%s2156_s10] ss:$0 sm:$0xff]  ;;  %s1816_s10 = smov [#allocation13]  }
 0x31c   :  { %s1067_s21 = sshll.u32 %s1816_s10, 4  ;;  %s1068_s21 = int_to_ptr.vmem [resolvable:$true] %s1067_s21 }
 0x31d   :  { %v791_v7 = vmax.f32 %v768_v62, 0.0  ;;  %v683_v8 = vadd.f32 %v1149_v63, %v1083_v52  ;;  %v1150_v10 = vpop.f32.mrb[14].mxu1  ;;  %v1197_v11 = vpop.f32.mrb[24].mxu0  ;;  %s1771_s22 = scalar_lea.vmem %s1068_s21, 640  ;;  %p1776_p7 = scmp.lt.s32.totalorder %s1068_s21, %s1068_s21 }
 0x31e   :  { %v1151_v12 = vpop.f32.mrb[15].mxu1  ;;  %v1198_v13 = vpop.f32.mrb[25].mxu0  ;;  %p1772_p6 = scmp.ne.s32.totalorder %s1068_s21, %s1771_s22  ;;  %p1777_p8 = scmp.lt.s32.totalorder %s1771_s22, %s1771_s22 }
 0x31f   :  { %v773_v14 = vadd.f32 %v1196_v2, %v683_v8  ;;  %v1152_v15 = vadd.f32 %v1151_v12, %v1150_v10  ;;  %v1199_v16 = vadd.f32 %v1198_v13, %v1197_v11  ;;  %1328 = vmatmul.mubr.f32.vlgmr.msra.gmra.mrb[20].mxu1 %v791_v7 }
 0x320   :  { %1330 = vmatprep.mubr.msk.f32.mxu1 %vm1814_vm0, %v1815_v1  ;;  %1597 = vmatpush3.bf16.msra.mxu1 %v1566_v32  ;;  %p1778_p9 = por %p1777_p8, %p1776_p7 }
 0x321   :  { %v792_v17 = vmax.f32 %v773_v14, 0.0  ;;  %v688_v18 = vadd.f32 %v1152_v15, %v1083_v52  ;;  %v1153_v19 = vpop.f32.mrb[16].mxu1  ;;  %v1200_v20 = vpop.f32.mrb[26].mxu0  ;;  %1590 = vmatprep.subr.bf16.mxu1 %v1813_v0 }
 0x322   :  { %v1154_v21 = vpop.f32.mrb[17].mxu1  ;;  %v1201_v3 = vpop.f32.mrb[27].mxu0  ;;  %p1779_p10 = pnand %p1778_p9, %p1772_p6 }
 0x323   :  { %v778_v22 = vadd.f32 %v1199_v16, %v688_v18  ;;  %v1155_v4 = vadd.f32 %v1154_v21, %v1153_v19  ;;  %v1202_v23 = vadd.f32 %v1201_v3, %v1200_v20  ;;  %1331 = vmatmul.mubr.f32.gmra.mrb[22].mxu1 %v792_v17 }
 0x324   :  { %1333 = vmatprep.mubr.msk.f32.mxu1 %vm1814_vm0, %v1815_v1  ;;  %1598 = vmatpush3.bf16.msra.mxu1 %v2068_v34  ;;  %v928_v34 = vld [vmem:[#allocation11 + $0x70] sm:$0xff] }
 0x325   :  { %v793_v24 = vmax.f32 %v778_v22, 0.0  ;;  %v693_v5 = vadd.f32 %v1155_v4, %v1083_v52  ;;  %v1156_v6 = vpop.f32.mrb[18].mxu1  ;;  %v1203_v25 = vpop.f32.mrb[28].mxu0  ;;  %1591 = vmatprep.subr.bf16.mxu1 %v1813_v0  ;;  %v1587_v36 = vpack.c.bf16 %v929_v35, %v928_v34 }
 0x326   :  { %v1157_v26 = vpop.f32.mrb[19].mxu1  ;;  %v1204_v27 = vpop.f32.mrb[29].mxu0 }
 0x327   :  { %v783_v28 = vadd.f32 %v1202_v23, %v693_v5  ;;  %v1158_v9 = vadd.f32 %v1157_v26, %v1156_v6  ;;  %v1205_v29 = vadd.f32 %v1204_v27, %v1203_v25  ;;  %1334 = vmatmul.mubr.f32.gmra.mrb[24].mxu1 %v793_v24  ;;  %1588 = vmatpush3.bf16.msra.mxu0 %v1587_v36 }
 0x328   :  { %1336 = vmatprep.mubr.msk.f32.mxu1 %vm1814_vm0, %v1815_v1  ;;  %1599 = vmatpush3.bf16.msra.mxu1 %v2072_v37  ;;  %v1084_v37 = vld [vmem:[%s2154_s8] ss:$0 sm:$0xff] }
 0x329   :  { %v794_v30 = vmax.f32 %v783_v28, 0.0  ;;  %v698_v31 = vadd.f32 %v1158_v9, %v1083_v52  ;;  %1592 = vmatprep.subr.bf16.mxu1 %v1813_v0 }
 0x32b   :  { %v788_v32 = vadd.f32 %v1205_v29, %v698_v31  ;;  %1337 = vmatmul.mubr.f32.gmra.mrb[26].mxu1 %v794_v30 }
 0x32c   :  { %1339 = vmatprep.mubr.msk.f32.mxu1 %vm1814_vm0, %v1815_v1  ;;  %1600 = vmatpush3.bf16.msra.mxu1 %v2076_v40 }
 0x32d   :  { %v795_v33 = vmax.f32 %v788_v32, 0.0  ;;  %1593 = vmatprep.subr.bf16.mxu1 %v1813_v0 }
 0x32f   :  { %1340 = vmatmul.mubr.f32.gmra.mrb[28].mxu1 %v795_v33 }
 0x330   :  { %1601 = vmatpush3.bf16.msra.mxu1 %v2080_v43  ;;  %1383 = vmatprep.mubr.msk.f32.mxu1 %vm1814_vm0, %v1815_v1 }
 0x331   :  { %1594 = vmatprep.subr.bf16.mxu1 %v1813_v0 }
 0x334   :  { %1602 = vmatpush3.bf16.msra.mxu1 %v2084_v46 }
 0x335   :  { %1595 = vmatprep.subr.bf16.mxu1 %v1813_v0 }
 0x338   :  { %1603 = vmatpush3.bf16.msra.mxu1 %v2088_v49 }
 0x339   :  { %1596 = vmatprep.subr.bf16.mxu1 %v1813_v0 }
 0x33c   :  { %1604 = vmatpush3.bf16.msra.mxu1 %v1587_v36 }
 0x3f2   :  { %v885_v38 = vpop.f32.mrb[20].mxu1 }
 0x3f3   :  { %v886_v39 = vadd.f32 %v1084_v37, %v885_v38  ;;  %v1329_v40 = vpop.f32.mrb[21].mxu1 }
 0x3f5   :  { %v909_v41 = vmax.f32 %v886_v39, 0.0 }
 0x3f6   :  { %v890_v42 = vpop.f32.mrb[22].mxu1 }
 0x3f7   :  { %v891_v43 = vadd.f32 %v1084_v37, %v890_v42  ;;  %v1332_v44 = vpop.f32.mrb[23].mxu1  ;;  %1375 = vmatmul.mubr.f32.vlgmr.msra.gmra.mrb[30].mxu0 %v909_v41 }
 0x3f8   :  { %1377 = vmatprep.mubr.msk.f32.mxu0 %vm1814_vm0, %v1815_v1 }
 0x3f9   :  { %v910_v0 = vmax.f32 %v891_v43, 0.0 }
 0x3fa   :  { %v895_v45 = vpop.f32.mrb[24].mxu1 }
 0x3fb   :  { %v896_v46 = vadd.f32 %v1084_v37, %v895_v45  ;;  %v1335_v47 = vpop.f32.mrb[25].mxu1  ;;  %1378 = vmatmul.mubr.f32.gmra.mrb[32].mxu0 %v910_v0 }
 0x3fc   :  { %1380 = vmatprep.mubr.msk.f32.mxu0 %vm1814_vm0, %v1815_v1 }
 0x3fd   :  { %v911_v48 = vmax.f32 %v896_v46, 0.0 }
 0x3fe   :  { %v900_v49 = vpop.f32.mrb[26].mxu1 }
 0x3ff   :  { %v901_v50 = vadd.f32 %v1084_v37, %v900_v49  ;;  %v1338_v51 = vpop.f32.mrb[27].mxu1  ;;  %1381 = vmatmul.mubr.f32.gmra.mrb[34].mxu0 %v911_v48 }
 0x401   :  { %v912_v52 = vmax.f32 %v901_v50, 0.0 }
 0x402   :  { %v905_v53 = vpop.f32.mrb[28].mxu1 }
 0x403   :  { %v906_v54 = vadd.f32 %v1084_v37, %v905_v53  ;;  %v1341_v55 = vpop.f32.mrb[29].mxu1  ;;  %1384 = vmatmul.mubr.f32.vlgmr.msra.gmra.mrb[30].mxu1 %v912_v52 }
 0x404   :  { %1386 = vmatprep.mubr.msk.f32.mxu1 %vm1814_vm0, %v1815_v1 }
 0x405   :  { %v913_v56 = vmax.f32 %v906_v54, 0.0 }
 0x407   :  { %1387 = vmatmul.mubr.f32.gmra.mrb[32].mxu1 %v913_v56 }
 0x4ca   :  { %v1003_v58 = vpop.f32.mrb[30].mxu0 }
 0x4cb   :  { %v1004_v59 = vadd.f32 %v1085_v57, %v1003_v58  ;;  %v1376_v60 = vpop.f32.mrb[31].mxu0 }
 0x4cd   :  { %v1086_v61 = vmul.f32 -1.442695, %v1004_v59 }
 0x4ce   :  { %v1008_v62 = vpop.f32.mrb[32].mxu0 }
 0x4cf   :  { %1619 = vpow2.f32 %v1086_v61  ;;  %v1009_v63 = vadd.f32 %v1085_v57, %v1008_v62  ;;  %v1379_v2 = vpop.f32.mrb[33].mxu0 }
 0x4d1   :  { %v1087_v7 = vmul.f32 -1.442695, %v1009_v63 }
 0x4d2   :  { %v1013_v8 = vpop.f32.mrb[34].mxu0 }
 0x4d3   :  { %1621 = vpow2.f32 %v1087_v7  ;;  %v1014_v10 = vadd.f32 %v1085_v57, %v1013_v8  ;;  %v1382_v11 = vpop.f32.mrb[35].mxu0 }
 0x4d5   :  { %v1088_v1 = vmul.f32 -1.442695, %v1014_v10 }
 0x4d6   :  { %v1018_v12 = vpop.f32.mrb[30].mxu1 }
 0x4d7   :  { %1623 = vpow2.f32 %v1088_v1  ;;  %v1019_v13 = vadd.f32 %v1085_v57, %v1018_v12  ;;  %v1385_v14 = vpop.f32.mrb[31].mxu1 }
 0x4d9   :  { %v1620_v15 = vpop.eup %1619  ;;  %v1089_v16 = vmul.f32 -1.442695, %v1019_v13 }
 0x4da   :  { %v1042_v17 = vadd.f32 1.0, %v1620_v15  ;;  %v1023_v18 = vpop.f32.mrb[32].mxu1 }
 0x4db   :  { %1625 = vpow2.f32 %v1089_v16  ;;  %v1024_v19 = vadd.f32 %v1085_v57, %v1023_v18  ;;  %v1388_v20 = vpop.f32.mrb[33].mxu1 }
 0x4dc   :  { %1627 = vrcp.f32 %v1042_v17 }
 0x4dd   :  { %v1622_v21 = vpop.eup %1621  ;;  %v1090_v3 = vmul.f32 -1.442695, %v1024_v19 }
 0x4de   :  { %v1043_v22 = vadd.f32 1.0, %v1622_v21 }
 0x4df   :  { %1629 = vpow2.f32 %v1090_v3 }
 0x4e0   :  { %1631 = vrcp.f32 %v1043_v22 }
 0x4e1   :  { %v1624_v4 = vpop.eup %1623 }
 0x4e2   :  { %v1044_v23 = vadd.f32 1.0, %v1624_v4 }
 0x4e4   :  { %1633 = vrcp.f32 %v1044_v23 }
 0x4e5   :  { %v1626_v24 = vpop.eup %1625 }
 0x4e6   :  { %v1628_v5 = vpop.eup %1627  ;;  %v1045_v6 = vadd.f32 1.0, %v1626_v24 }
 0x4e7   :  { %1057 = vst [vmem:[#allocation13] sm:$0xff] %v1628_v5 }
 0x4e8   :  { %1635 = vrcp.f32 %v1045_v6 }
 0x4e9   :  { %v1630_v25 = vpop.eup %1629 }
 0x4ea   :  { %v1632_v26 = vpop.eup %1631  ;;  %v1046_v27 = vadd.f32 1.0, %v1630_v25 }
 0x4eb   :  { %1058 = vst [vmem:[#allocation13 + $0x8] sm:$0xff] %v1632_v26 }
 0x4ec   :  { %1637 = vrcp.f32 %v1046_v27 }
 0x4ee   :  { %v1634_v28 = vpop.eup %1633 }
 0x4ef   :  { %1059 = vst [vmem:[#allocation13 + $0x10] sm:$0xff] %v1634_v28 }
 0x4f2   :  { %v1636_v9 = vpop.eup %1635 }
 0x4f3   :  { %1060 = vst [vmem:[#allocation13 + $0x18] sm:$0xff] %v1636_v9 }
 0x4f6   :  { %v1638_v29 = vpop.eup %1637 }
 0x4f7   :  { %1061 = vst [vmem:[#allocation13 + $0x20] sm:$0xff] %v1638_v29 }
 0x4f8   :  { %1782 = shalt.err (!%p1779_p10)
}
 0x4f9   :  { %s1783_s3 = scalar_lea.hbm %s2157_s11, 640 }
 0x4fa   :  { %p1784_p11 = scmp.ne.s32.totalorder %s2157_s11, %s1783_s3  ;;  %p1787_p12 = scmp.lt.u32.totalorder %s1783_s3, %s2157_s11 }
 0x4fc   :  { %p1789_p13 = pnand %p1787_p12, %p1784_p11 }
 0x4fe   :  { %1792 = shalt.err (!%p1789_p13)
}
 0x4ff   :  { %1073 = dma.vmem_to_hbm [thread:$0]  %s1068_s21, 640, %s2157_s11, [#allocation4], %s1805_s29, %s1805_s29, %s1806_s30  }
 0x500   :  { %1801 = dma.done.wait [#allocation4], 640  }
 0x501   :  { %1802 = vsyncadd [#allocation4], 4294966656 }
 0x502   :  { %1077 = vsyncpa [#allocation3], 1 }
 0x503   :  { %1078 = vsyncpa [#allocation6], 1 }
 0x504   :  { %1079 = vsyncpa [#allocation9], 1 }
 0x505   :  { %1080 = vsyncpa [#allocation12], 1 }
 0x506   :  { %1081 = vsyncpa [#allocation4], 1 }

</bundles_post_ra>
